<compile_context>
chip_gen: v7x
topology: tpu7x:2x2x1
jax: 0.10.0
libtpu: 0.0.40
codegen_flags: <defaults>
</compile_context>

<pallas_src>
import math

import jax
import jax.numpy as jnp
from jax import lax
from jax.experimental import pallas as pl
from jax.experimental.pallas import tpu as pltpu


_SMALL_CHANNEL_MAX = 16        # threshold for the VPU scalar-FMA path
_MIN_PARALLEL_STEPS = 4        # keep both v7x TensorCores busy
_VMEM_BUDGET_BYTES = 12 << 20  # fits every generation's scoped-VMEM default


def _round_up(v: int, m: int) -> int:
    return ((v + m - 1) // m) * m


def _vmem_budget_bytes() -> int:
    budget = _VMEM_BUDGET_BYTES
    try:  # refine against the actual chip (v7x has only 64 MiB physical VMEM)
        info = pltpu.get_tpu_info()
        budget = min(budget, int(info.vmem_capacity_bytes) // 4)
    except Exception:
        pass
    return budget


def _pick_k_tile(c_in: int, k_tile_max: int) -> int:
    """C_in tile for the MXU path.

    Only splits when the tile is a multiple of 128 that divides C_in exactly,
    so the (8,128) layout rule holds and no ragged-K garbage can enter the
    contraction; otherwise the full C_in is loaded per step.
    """
    if c_in <= k_tile_max:
        return c_in
    if c_in % 128 == 0:
        start = min(_round_up(k_tile_max, 128), c_in)
        start = (start // 128) * 128
        for tk in range(start, 127, -128):
            if c_in % tk == 0:
                return tk
    return c_in


def _pick_lane_tile(hw: int, tk: int, c_out: int, itemsize: int,
                    budget_bytes: int) -> int:
    """Largest 128-multiple spatial (lane) tile whose double-buffered
    footprint (x tile, out tile, f32 accumulator) fits the VMEM budget."""
    rounded_hw = _round_up(hw, 128)
    sub_in = _round_up(tk, 8)        # sublane padding of the x tile
    sub_out = _round_up(c_out, 8)    # sublane padding of out / accumulator
    per_lane = 2 * sub_in * itemsize + 2 * sub_out * itemsize + sub_out * 4
    tl = (budget_bytes // per_lane) // 128 * 128
    return max(128, min(tl, rounded_hw))


def _outconv_vpu_kernel(x_ref, w_ref, b_ref, o_ref):
    """Tiny-channel path: scalar-weight FMAs on the VPU.

    x_ref: (C_in, TL) VMEM     w_ref: (C_out, C_in) SMEM (f32 scalars)
    b_ref: (C_out,)   SMEM     o_ref: (C_out, TL) VMEM
    """
    x = x_ref[...].astype(jnp.float32)
    c_out, c_in = w_ref.shape
    rows = []
    for o in range(c_out):                       # unrolled at trace time
        acc = x[0:1, :] * w_ref[o, 0]
        for c in range(1, c_in):
            acc = acc + x[c:c + 1, :] * w_ref[o, c]
        acc = acc + b_ref[o]
        rows.append(acc)
    out = rows[0] if c_out == 1 else jnp.concatenate(rows, axis=0)
    o_ref[...] = out.astype(o_ref.dtype)


def _outconv_mxu_kernel(x_ref, w_ref, b_ref, o_ref, acc_ref):
    """General path: MXU matmul with K-axis (C_in) accumulation.

    x_ref: (TK, TL)   w_ref: (C_out, TK)   b_ref: (C_out, 1) f32
    o_ref: (C_out, TL)                     acc_ref: (C_out, TL) f32 scratch
    """
    k = pl.program_id(2)

    @pl.when(k == 0)
    def _():
        acc_ref[...] = jnp.zeros_like(acc_ref)

    prec = lax.Precision.HIGHEST if x_ref.dtype == jnp.float32 else None
    acc_ref[...] += jnp.dot(w_ref[...], x_ref[...], precision=prec,
                            preferred_element_type=jnp.float32)

    @pl.when(k == pl.num_programs(2) - 1)
    def _():
        o_ref[...] = (acc_ref[...] + b_ref[...]).astype(o_ref.dtype)


def outconv_forward(x: jax.Array, weight: jax.Array, bias=None, *,
                    k_tile_max: int = 512) -> jax.Array:
    """1x1 (2d) / 1x1x1 (3d) convolution: out[n,o,...] = sum_c w[o,c]*x[n,c,...] (+ b[o]).

    x:      (N, C_in, *spatial)          -- NCHW (2d) or NCDHW (3d)
    weight: (C_out, C_in[, 1, 1[, 1]])   -- PyTorch conv weight
    bias:   optional (C_out,)
    """
    N, C_in = int(x.shape[0]), int(x.shape[1])
    spatial = x.shape[2:]
    HW = int(math.prod(spatial)) if spatial else 1
    C_out = int(weight.shape[0])
    w2 = weight.reshape(C_out, -1)
    assert w2.shape[1] == C_in, "weight must be a 1x1 conv kernel"

    x3 = x.reshape(N, C_in, HW)          # free, contiguous reshape (NCHW kept)
    itemsize = jnp.dtype(x.dtype).itemsize
    budget = _vmem_budget_bytes()

    small_channels = (C_in <= _SMALL_CHANNEL_MAX) and (C_out <= _SMALL_CHANNEL_MAX)
    tk = C_in if small_channels else _pick_k_tile(C_in, k_tile_max)

    # Weight tile is double-buffered too; reserve its bytes before sizing TL.
    w_bytes = 2 * _round_up(C_out, 8) * _round_up(tk, 128) * itemsize
    tl = _pick_lane_tile(HW, tk, C_out, itemsize, max(budget - w_bytes, 2 << 20))

    # Megacore (v7x): make sure the parallel (N, spatial) axes have enough
    # steps for both TensorCores; shrinking TL only reduces VMEM pressure.
    rounded_hw = _round_up(HW, 128)
    num_l = pl.cdiv(HW, tl)
    if N * num_l < _MIN_PARALLEL_STEPS and rounded_hw > 128:
        want_l = -(-_MIN_PARALLEL_STEPS // N)
        tl = min(tl, max(128, _round_up(-(-HW // want_l), 128)))
        num_l = pl.cdiv(HW, tl)

    cost = pl.CostEstimate(
        flops=2 * N * C_out * C_in * HW,
        bytes_accessed=(N * (C_in + C_out) * HW + C_out * C_in) * itemsize,
        transcendentals=0,
    )
    out_shape = jax.ShapeDtypeStruct((N, C_out, HW), x.dtype)

    if small_channels:
        w_arg = w2.astype(jnp.float32)                         # SMEM scalars
        b_arg = (jnp.zeros((C_out,), jnp.float32) if bias is None
                 else bias.reshape(C_out).astype(jnp.float32))
        out3 = pl.pallas_call(
            _outconv_vpu_kernel,
            out_shape=out_shape,
            grid_spec=pltpu.PrefetchScalarGridSpec(
                num_scalar_prefetch=0,
                grid=(N, num_l),
                in_specs=[
                    pl.BlockSpec((None, C_in, tl), lambda n, l: (n, 0, l)),
                    pl.BlockSpec(memory_space=pltpu.MemorySpace.SMEM),
                    pl.BlockSpec(memory_space=pltpu.MemorySpace.SMEM),
                ],
                out_specs=pl.BlockSpec((None, C_out, tl), lambda n, l: (n, 0, l)),
            ),
            compiler_params=pltpu.CompilerParams(
                dimension_semantics=("parallel", "parallel")),
            cost_estimate=cost,
        )(x3, w_arg, b_arg)
    else:
        num_k = pl.cdiv(C_in, tk)        # exact by construction of tk
        w_arg = w2.astype(x.dtype)
        b_arg = (jnp.zeros((C_out, 1), jnp.float32) if bias is None
                 else bias.reshape(C_out, 1).astype(jnp.float32))
        out3 = pl.pallas_call(
            _outconv_mxu_kernel,
            out_shape=out_shape,
            grid_spec=pltpu.PrefetchScalarGridSpec(
                num_scalar_prefetch=0,
                grid=(N, num_l, num_k),
                in_specs=[
                    pl.BlockSpec((None, tk, tl), lambda n, l, k: (n, k, l)),
                    pl.BlockSpec((C_out, tk), lambda n, l, k: (0, k)),
                    pl.BlockSpec((C_out, 1), lambda n, l, k: (0, 0)),
                ],
                out_specs=pl.BlockSpec((None, C_out, tl),
                                       lambda n, l, k: (n, 0, l)),
                scratch_shapes=[pltpu.VMEM((C_out, tl), jnp.float32)],
            ),
            compiler_params=pltpu.CompilerParams(
                dimension_semantics=("parallel", "parallel", "arbitrary")),
            cost_estimate=cost,
        )(x3, w_arg, b_arg)

    return out3.reshape(N, C_out, *spatial)


if __name__ == "__main__":
    key = jax.random.PRNGKey(0)
    hi = lax.Precision.HIGHEST

    # --- 2d, bias=False (module default): tiny channels -> VPU path ---
    k1, k2, key = jax.random.split(key, 3)
    N, C_in, C_out, H, W = 2, 4, 3, 16, 16
    x = jax.random.normal(k1, (N, C_in, H, W), dtype=jnp.float32)
    bound = 1.0 / math.sqrt(C_in)
    w = jax.random.uniform(k2, (C_out, C_in, 1, 1), minval=-bound,
                           maxval=bound, dtype=jnp.float32)
    out = jax.block_until_ready(outconv_forward(x, w))
    ref = jnp.einsum("nchw,oc->nohw", x, w.reshape(C_out, C_in), precision=hi)
    assert out.shape == (N, C_out, H, W)
    assert jnp.allclose(out, ref, atol=1e-5, rtol=1e-5)

    # --- 3d, bias=False: VPU path, three spatial dims ---
    k1, k2, key = jax.random.split(key, 3)
    N, C_in, C_out, D, H, W = 1, 4, 2, 8, 8, 8
    x = jax.random.normal(k1, (N, C_in, D, H, W), dtype=jnp.float32)
    w = jax.random.normal(k2, (C_out, C_in, 1, 1, 1), dtype=jnp.float32) * 0.25
    out = jax.block_until_ready(outconv_forward(x, w))
    ref = jnp.einsum("ncdhw,oc->nodhw", x, w.reshape(C_out, C_in), precision=hi)
    assert out.shape == (N, C_out, D, H, W)
    assert jnp.allclose(out, ref, atol=1e-5, rtol=1e-5)

    # --- larger channels -> MXU path (single K step) ---
    k1, k2, key = jax.random.split(key, 3)
    N, C_in, C_out, H, W = 1, 64, 32, 16, 16
    x = jax.random.normal(k1, (N, C_in, H, W), dtype=jnp.float32)
    w = jax.random.normal(k2, (C_out, C_in), dtype=jnp.float32) / math.sqrt(C_in)
    out = jax.block_until_ready(outconv_forward(x, w))
    ref = jnp.einsum("nchw,oc->nohw", x, w, precision=hi)
    assert jnp.allclose(out, ref, atol=1e-4, rtol=1e-4)

    # --- MXU path with K-axis accumulation + bias ---
    k1, k2, k3, key = jax.random.split(key, 4)
    N, C_in, C_out, H, W = 1, 256, 20, 16, 16
    x = jax.random.normal(k1, (N, C_in, H, W), dtype=jnp.float32)
    w = jax.random.normal(k2, (C_out, C_in), dtype=jnp.float32) / math.sqrt(C_in)
    b = jax.random.normal(k3, (C_out,), dtype=jnp.float32)
    out = jax.block_until_ready(outconv_forward(x, w, b, k_tile_max=128))
    ref = jnp.einsum("nchw,oc->nohw", x, w, precision=hi) + b[None, :, None, None]
    assert jnp.allclose(out, ref, atol=1e-4, rtol=1e-4)

    print("KERNEL_OK")
</pallas_src>

<mosaic_0001>
module attributes {stable_mosaic.version = 11 : i64} {
  func.func @_outconv_vpu_kernel(%arg0: i32, %arg1: i32, %arg2: memref<1x4x128xf32, #tpu.memory_space<vmem>>, %arg3: memref<3x4xf32, #tpu.memory_space<smem>>, %arg4: memref<3xf32, #tpu.memory_space<smem>>, %arg5: memref<1x3x128xf32, #tpu.memory_space<vmem>>) attributes {dimension_semantics = [#tpu.dimension_semantics<parallel>, #tpu.dimension_semantics<parallel>], iteration_bounds = array<i64: 2, 2>, scalar_prefetch = 0 : i64, scratch_operands = 0 : i64, tpu.core_type = #tpu.core_type<tc>, window_params = [{transform_indices = @transform_0, window_bounds = array<i64: 1, 4, 128>}, {transform_indices = @transform_1, window_bounds = array<i64: 3, 4>}, {transform_indices = @transform_2, window_bounds = array<i64: 3>}, {transform_indices = @transform_3, window_bounds = array<i64: 1, 3, 128>}]} {
    %c0 = arith.constant 0 : index
    %c0_0 = arith.constant 0 : index
    %c0_1 = arith.constant 0 : index
    %0 = vector.load %arg2[%c0, %c0_0, %c0_1] : memref<1x4x128xf32, #tpu.memory_space<vmem>>, vector<1x4x128xf32>
    %1 = vector.shape_cast %0 : vector<1x4x128xf32> to vector<4x128xf32>
    %2 = vector.extract_strided_slice %1 {offsets = [0, 0], sizes = [1, 128], strides = [1, 1]} : vector<4x128xf32> to vector<1x128xf32>
    %c0_2 = arith.constant 0 : index
    %c0_3 = arith.constant 0 : index
    %3 = memref.load %arg3[%c0_2, %c0_3] : memref<3x4xf32, #tpu.memory_space<smem>>
    %4 = vector.broadcast %3 : f32 to vector<1x128xf32>
    %5 = arith.mulf %2, %4 : vector<1x128xf32>
    %6 = vector.extract_strided_slice %1 {offsets = [1, 0], sizes = [1, 128], strides = [1, 1]} : vector<4x128xf32> to vector<1x128xf32>
    %c0_4 = arith.constant 0 : index
    %c1 = arith.constant 1 : index
    %7 = memref.load %arg3[%c0_4, %c1] : memref<3x4xf32, #tpu.memory_space<smem>>
    %8 = vector.broadcast %7 : f32 to vector<1x128xf32>
    %9 = arith.mulf %6, %8 : vector<1x128xf32>
    %10 = arith.addf %5, %9 : vector<1x128xf32>
    %11 = vector.extract_strided_slice %1 {offsets = [2, 0], sizes = [1, 128], strides = [1, 1]} : vector<4x128xf32> to vector<1x128xf32>
    %c0_5 = arith.constant 0 : index
    %c2 = arith.constant 2 : index
    %12 = memref.load %arg3[%c0_5, %c2] : memref<3x4xf32, #tpu.memory_space<smem>>
    %13 = vector.broadcast %12 : f32 to vector<1x128xf32>
    %14 = arith.mulf %11, %13 : vector<1x128xf32>
    %15 = arith.addf %10, %14 : vector<1x128xf32>
    %16 = vector.extract_strided_slice %1 {offsets = [3, 0], sizes = [1, 128], strides = [1, 1]} : vector<4x128xf32> to vector<1x128xf32>
    %c0_6 = arith.constant 0 : index
    %c3 = arith.constant 3 : index
    %17 = memref.load %arg3[%c0_6, %c3] : memref<3x4xf32, #tpu.memory_space<smem>>
    %18 = vector.broadcast %17 : f32 to vector<1x128xf32>
    %19 = arith.mulf %16, %18 : vector<1x128xf32>
    %20 = arith.addf %15, %19 : vector<1x128xf32>
    %c0_7 = arith.constant 0 : index
    %21 = memref.load %arg4[%c0_7] : memref<3xf32, #tpu.memory_space<smem>>
    %22 = vector.broadcast %21 : f32 to vector<1x128xf32>
    %23 = arith.addf %20, %22 : vector<1x128xf32>
    %24 = vector.extract_strided_slice %1 {offsets = [0, 0], sizes = [1, 128], strides = [1, 1]} : vector<4x128xf32> to vector<1x128xf32>
    %c1_8 = arith.constant 1 : index
    %c0_9 = arith.constant 0 : index
    %25 = memref.load %arg3[%c1_8, %c0_9] : memref<3x4xf32, #tpu.memory_space<smem>>
    %26 = vector.broadcast %25 : f32 to vector<1x128xf32>
    %27 = arith.mulf %24, %26 : vector<1x128xf32>
    %28 = vector.extract_strided_slice %1 {offsets = [1, 0], sizes = [1, 128], strides = [1, 1]} : vector<4x128xf32> to vector<1x128xf32>
    %c1_10 = arith.constant 1 : index
    %c1_11 = arith.constant 1 : index
    %29 = memref.load %arg3[%c1_10, %c1_11] : memref<3x4xf32, #tpu.memory_space<smem>>
    %30 = vector.broadcast %29 : f32 to vector<1x128xf32>
    %31 = arith.mulf %28, %30 : vector<1x128xf32>
    %32 = arith.addf %27, %31 : vector<1x128xf32>
    %33 = vector.extract_strided_slice %1 {offsets = [2, 0], sizes = [1, 128], strides = [1, 1]} : vector<4x128xf32> to vector<1x128xf32>
    %c1_12 = arith.constant 1 : index
    %c2_13 = arith.constant 2 : index
    %34 = memref.load %arg3[%c1_12, %c2_13] : memref<3x4xf32, #tpu.memory_space<smem>>
    %35 = vector.broadcast %34 : f32 to vector<1x128xf32>
    %36 = arith.mulf %33, %35 : vector<1x128xf32>
    %37 = arith.addf %32, %36 : vector<1x128xf32>
    %38 = vector.extract_strided_slice %1 {offsets = [3, 0], sizes = [1, 128], strides = [1, 1]} : vector<4x128xf32> to vector<1x128xf32>
    %c1_14 = arith.constant 1 : index
    %c3_15 = arith.constant 3 : index
    %39 = memref.load %arg3[%c1_14, %c3_15] : memref<3x4xf32, #tpu.memory_space<smem>>
    %40 = vector.broadcast %39 : f32 to vector<1x128xf32>
    %41 = arith.mulf %38, %40 : vector<1x128xf32>
    %42 = arith.addf %37, %41 : vector<1x128xf32>
    %c1_16 = arith.constant 1 : index
    %43 = memref.load %arg4[%c1_16] : memref<3xf32, #tpu.memory_space<smem>>
    %44 = vector.broadcast %43 : f32 to vector<1x128xf32>
    %45 = arith.addf %42, %44 : vector<1x128xf32>
    %46 = vector.extract_strided_slice %1 {offsets = [0, 0], sizes = [1, 128], strides = [1, 1]} : vector<4x128xf32> to vector<1x128xf32>
    %c2_17 = arith.constant 2 : index
    %c0_18 = arith.constant 0 : index
    %47 = memref.load %arg3[%c2_17, %c0_18] : memref<3x4xf32, #tpu.memory_space<smem>>
    %48 = vector.broadcast %47 : f32 to vector<1x128xf32>
    %49 = arith.mulf %46, %48 : vector<1x128xf32>
    %50 = vector.extract_strided_slice %1 {offsets = [1, 0], sizes = [1, 128], strides = [1, 1]} : vector<4x128xf32> to vector<1x128xf32>
    %c2_19 = arith.constant 2 : index
    %c1_20 = arith.constant 1 : index
    %51 = memref.load %arg3[%c2_19, %c1_20] : memref<3x4xf32, #tpu.memory_space<smem>>
    %52 = vector.broadcast %51 : f32 to vector<1x128xf32>
    %53 = arith.mulf %50, %52 : vector<1x128xf32>
    %54 = arith.addf %49, %53 : vector<1x128xf32>
    %55 = vector.extract_strided_slice %1 {offsets = [2, 0], sizes = [1, 128], strides = [1, 1]} : vector<4x128xf32> to vector<1x128xf32>
    %c2_21 = arith.constant 2 : index
    %c2_22 = arith.constant 2 : index
    %56 = memref.load %arg3[%c2_21, %c2_22] : memref<3x4xf32, #tpu.memory_space<smem>>
    %57 = vector.broadcast %56 : f32 to vector<1x128xf32>
    %58 = arith.mulf %55, %57 : vector<1x128xf32>
    %59 = arith.addf %54, %58 : vector<1x128xf32>
    %60 = vector.extract_strided_slice %1 {offsets = [3, 0], sizes = [1, 128], strides = [1, 1]} : vector<4x128xf32> to vector<1x128xf32>
    %c2_23 = arith.constant 2 : index
    %c3_24 = arith.constant 3 : index
    %61 = memref.load %arg3[%c2_23, %c3_24] : memref<3x4xf32, #tpu.memory_space<smem>>
    %62 = vector.broadcast %61 : f32 to vector<1x128xf32>
    %63 = arith.mulf %60, %62 : vector<1x128xf32>
    %64 = arith.addf %59, %63 : vector<1x128xf32>
    %c2_25 = arith.constant 2 : index
    %65 = memref.load %arg4[%c2_25] : memref<3xf32, #tpu.memory_space<smem>>
    %66 = vector.broadcast %65 : f32 to vector<1x128xf32>
    %67 = arith.addf %64, %66 : vector<1x128xf32>
    %68 = tpu.concatenate %23, %45, %67 in 0 : vector<1x128xf32>, vector<1x128xf32>, vector<1x128xf32> -> vector<3x128xf32>
    %c0_26 = arith.constant 0 : index
    %c0_27 = arith.constant 0 : index
    %c0_28 = arith.constant 0 : index
    %69 = vector.load %arg5[%c0_26, %c0_27, %c0_28] : memref<1x3x128xf32, #tpu.memory_space<vmem>>, vector<1x3x128xf32>
    %70 = vector.shape_cast %69 : vector<1x3x128xf32> to vector<3x128xf32>
    %71 = vector.shape_cast %68 : vector<3x128xf32> to vector<1x3x128xf32>
    tpu.vector_store %arg5[%c0_26, %c0_27, %c0_28], %71 {strides = array<i32>} : memref<1x3x128xf32, #tpu.memory_space<vmem>>, vector<1x3x128xf32>,
    return
  }
  func.func @transform_0(%arg0: i32, %arg1: i32) -> (i32, i32, i32) {
    %c0_i32 = arith.constant 0 : i32
    %c0_i32_0 = arith.constant 0 : i32
    return %arg0, %c0_i32, %arg1 : i32, i32, i32
  }
  func.func @transform_1(%arg0: i32, %arg1: i32) -> (i32, i32) {
    %c0_i32 = arith.constant 0 : i32
    %c0_i32_0 = arith.constant 0 : i32
    %c0_i32_1 = arith.constant 0 : i32
    return %c0_i32, %c0_i32_0 : i32, i32
  }
  func.func @transform_2(%arg0: i32, %arg1: i32) -> i32 {
    %c0_i32 = arith.constant 0 : i32
    %c0_i32_0 = arith.constant 0 : i32
    return %c0_i32 : i32
  }
  func.func @transform_3(%arg0: i32, %arg1: i32) -> (i32, i32, i32) {
    %c0_i32 = arith.constant 0 : i32
    %c0_i32_0 = arith.constant 0 : i32
    return %arg0, %c0_i32, %arg1 : i32, i32, i32
  }
}

</mosaic_0001>

<bundles_post_ra>
// kernel: tpu_custom_call.1
= control target key start
LH: loop header
LB: loop body
LE: loop exit
PB: predicated region body
PF: predicated region fallthrough
CT: control target
= control target key end

     0   :  { %s943_s0 = inlined_call_operand.hbm [shape: f32[2,4,256], index: 0, kind: input, shape index: {}]   ;;  %s944_s1 = inlined_call_operand.hbm [shape: f32[3,4], index: 1, kind: input, shape index: {}]   ;;  %s945_s2 = inlined_call_operand.vmem [shape: f32[3], index: 2, kind: input, shape index: {}]   ;;  %s946_s3 = inlined_call_operand.vmem [shape: f32[2,3,256], index: 3, kind: output, shape index: {}]  }
   0x1   :  { %950 = sst [smem:[#allocation11_spill]] %s944_s1 }
   0x2   :  { %8 = vsyncpa [#allocation3], 0 }
   0x3   :  { %10 = vsyncpa [#allocation3 + $0x1], 0 }
   0x4   :  { %11 = vsyncpa [#allocation4], 0 }
   0x5   :  { %12 = vsyncpa [#allocation5], 0  ;;  %s727_s12 = smov 0   ;;  %s729_s13 = smov 0  }
   0x6   :  { %s731_s14 = smov 0   ;;  %s733_s15 = smov 0  }
   0x7   :  { %s735_s16 = smov 0   ;;  %s737_s17 = smov 0  }
   0x8   :  { %s739_s18 = smov 0   ;;  %s741_s19 = smov 0  }
   0x9 LB: > { %s448_s20 = sadd.s32 4294967295, %s702_s19   ;;  %p52_p0 = scmp.ne.s32.totalorder %s678_s13, %s674_s12  ;;  %s702_s19 = sphi %s741_s19, %s18_s19   ;;  %s698_s18 = sphi %s739_s18, %s966_s18   ;;  %s694_s17 = sphi %s737_s17, %s965_s17   ;;  %s690_s16 = sphi %s735_s16, %s964_s16   ;;  %s686_s15 = sphi %s733_s15, %s963_s15   ;;  %s682_s14 = sphi %s731_s14, %s962_s14   ;;  %s678_s13 = sphi %s729_s13, %s961_s13   ;;  %s674_s12 = sphi %s727_s12, %s960_s12  }
   0xa   : > { %p767_p1 = scmp.eq.s32.totalorder %s448_s20, 0  ;;  %p450_p2 = scmp.ge.s32.totalorder %s702_s19, 1 }
   0xb   : > { %p133_p3 = scmp.lt.s32.totalorder %s702_s19, 5  ;;  %s155_s26 = sshll.u32 %s945_s2, 4  ;;  %s156_s26 = int_to_ptr.vmem [resolvable:$true] %s155_s26 }
   0xc   : > { %s951_s21 = scalar_select %p767_p1, 1, 0 }
   0xd   : > { %p775_p4 = por %p767_p1, %p52_p0  ;;  %p779_p5 = pnand %p450_p2, %p133_p3 }
   0xe   : > { %s955_s1 = sld [smem:[#allocation11_spill]] }
   0xf   : > { %s952_s22 = scalar_select %p775_p4, 1, 0 }
  0x10   : > { %p488_p6 = pneg %p779_p5 }
  0x12   : > { %p790_p7 = pnand %p488_p6, %p767_p1 }
  0x14   : > { %s570_s30 = scalar_lea.hbm %s955_s1, 64  ;;  %p572_p9 = pneg %p790_p7 }
  0x15   : > { %p571_p8 = scmp.ne.s32.totalorder %s955_s1, %s570_s30  ;;  %p577_p12 = scmp.lt.u32.totalorder %s570_s30, %s955_s1 }
  0x17   : > { %p573_p10 = pnand %p572_p9, %p571_p8 }
  0x19   : > { %p574_p11 = pneg %p573_p10 }
  0x1b   : > { %p579_p13 = pnand %p577_p12, %p574_p11 }
  0x1d   : > { %582 = shalt.err (!%p579_p13)
}
  0x1e   : > { %s704_s8 = smov [#allocation6]   ;;  %s583_s11 = scalar_lea.vmem %s156_s26, 16 }
  0x1f   : > { %491 = dma.hbm_to_smem (!%p790_p7), %s955_s1, 64, %s704_s8, [#allocation4]  }
  0x20   : > { %p584_p0 = scmp.ne.s32.totalorder %s156_s26, %s583_s11  ;;  %p591_p6 = scmp.lt.s32.totalorder %s156_s26, %s156_s26 }
  0x21   : > { %p592_p8 = scmp.lt.s32.totalorder %s583_s11, %s583_s11 }
  0x22   : > { %p586_p2 = pnand %p584_p0, %p572_p9 }
  0x23   : > { %p593_p10 = por %p592_p8, %p591_p6 }
  0x24   : > { %p587_p3 = pneg %p586_p2 }
  0x26   : > { %p594_p1 = pnand %p593_p10, %p587_p3 }
  0x28   : > { %597 = shalt.err (!%p594_p1)
}
  0x29   : > { %s705_s12 = smov [#allocation7]   ;;  %s27_s20 = sadd.s32 1, %s694_s17 }
  0x2a   : > { %494 = dma.vmem_to_smem (!%p790_p7), %s156_s26, 16, %s705_s12, [#allocation5]  }
  0x2b   : > { %s30_s24 = sadd.s32 1, %s698_s18  ;;  %p28_p9 = scmp.ge.s32.totalorder %s27_s20, 2 }
  0x2c   : > { %s39_s25 = sadd.s32 1, %s682_s14  ;;  %p46_p1 = scmp.ne.s32.totalorder %s682_s14, %s678_s13 }
  0x2d   : > { %p47_p11 = scmp.eq.s32.totalorder %s702_s19, 0  ;;  %s968_s20 = smov (%p28_p9, %s27_s20), 0 }
  0x2e   : > { %s970_s24 = smov (!%p28_p9, %s30_s24), %s698_s18  ;;  %s35_s27 = ssub.s32 %s694_s17, %s968_s20 }
  0x2f   : > { %p823_p12 = por %p47_p11, %p46_p1  ;;  %p32_p13 = scmp.ge.s32.totalorder %s970_s24, 2 }
  0x30   : > { %p501_p7 = scmp.lt.s32.totalorder %s702_s19, 4  ;;  %s166_s26 = sand.u32 1, %s682_s14  }
  0x31   : > { %s455_s29 = sshll.u32 %s698_s18, 1  ;;  %s972_s24 = smov (%p32_p13, %s970_s24), 0 }
  0x32   : > { %s454_s30 = sshll.u32 %s166_s26, 2  ;;  %s34_s4 = ssub.s32 %s698_s18, %s972_s24 }
  0x33   : > { %s36_s5 = sor.u32 %s35_s27, %s34_s4  ;;  %s175_s6 = sadd.s32 %s694_s17, %s455_s29 }
  0x34   : > { %p37_p0 = scmp.eq.s32.totalorder %s36_s5, 0  ;;  %s456_s7 = sshll.u32 %s175_s6, 6 }
  0x35   : > { %s838_s10 = scalar_lea.hbm %s943_s0, %s456_s7  ;;  %s170_s11 = scalar_lea.vmem [#allocation2], %s454_s30 }
  0x36   : > { %s179_s12 = sshll.u32 %s170_s11, 4  ;;  %p849_p2 = pnand %p501_p7, %p823_p12  ;;  %s843_s12 = int_to_ptr.vmem [resolvable:$true] %s179_s12 }
  0x37   : > { %s841_s1 = scalar_select %p37_p0, %s682_s14, %s39_s25  }
  0x38   : > { %s167_s29 = scalar_lea.sflag [#allocation3], %s166_s26  ;;  %s598_s4 = scalar_lea.hbm %s838_s10, 64 }
  0x39   : > { %p599_p3 = scmp.ne.s32.totalorder %s838_s10, %s598_s4  ;;  %p600_p6 = pneg %p849_p2 }
  0x3a   : > { %s603_s28 = scalar_lea.hbm %s943_s0, 256  ;;  %p604_p9 = scmp.lt.u32.totalorder %s838_s10, %s943_s0 }
  0x3b   : > { %p601_p8 = pnand %p600_p6, %p599_p3  ;;  %p605_p1 = scmp.lt.u32.totalorder %s603_s28, %s598_s4 }
  0x3c   : > { %p607_p12 = scmp.lt.u32.totalorder %s598_s4, %s838_s10 }
  0x3d   : > { %p602_p10 = pneg %p601_p8  ;;  %p606_p11 = por %p605_p1, %p604_p9 }
  0x3f   : > { %p608_p13 = por %p607_p12, %p606_p11 }
  0x41   : > { %p609_p7 = pnand %p608_p13, %p602_p10 }
  0x43   : > { %612 = shalt.err (!%p609_p7)
}
  0x44   : > { %s613_s26 = scalar_lea.vmem %s843_s12, 64  ;;  %s706_s7 = smov [#allocation2]  }
  0x45   : > { %p614_p0 = scmp.ne.s32.totalorder %s843_s12, %s613_s26  ;;  %s618_s8 = sshll.u32 %s706_s7, 4  ;;  %s619_s8 = int_to_ptr.vmem [resolvable:$false] %s618_s8 }
  0x46   : > { %s620_s9 = scalar_lea.vmem %s619_s8, 128  ;;  %p621_p4 = scmp.lt.s32.totalorder %s843_s12, %s619_s8 }
  0x47   : > { %p616_p3 = pnand %p614_p0, %p600_p6  ;;  %p622_p9 = scmp.lt.s32.totalorder %s620_s9, %s613_s26 }
  0x49   : > { %p617_p8 = pneg %p616_p3  ;;  %p623_p1 = por %p622_p9, %p621_p4 }
  0x4b   : > { %p624_p11 = pnand %p623_p1, %p617_p8 }
  0x4d   : > { %627 = shalt.err (!%p624_p11)
}
  0x4e   : > { %498 = dma.hbm_to_vmem [thread:$0]  (!%p849_p2), %s838_s10, 64, %s843_s12, %s167_s29  }
  0x4f   : > { %188 = sbr.rel (%p779_p5) target bundleno = 122 (0x7a), region = 32  ;;  %s190_s11 = sand.u32 (!%p779_p5), 1, %s678_s13  }
  0x50   : > { %s458_s4 = sshll.u32 (!%p779_p5), %s190_s11, 2  ;;  %s191_s25 = scalar_lea.sflag (!%p779_p5), [#allocation3], %s190_s11 }
  0x51   : > { %s194_s30 = scalar_lea.vmem (!%p779_p5), [#allocation2], %s458_s4  ;;  %p958_p6 = scmp.ne.s32.totalorder (!%p779_p5), %s952_s22, 0 }
  0x56   : > { %661 = dma.done.wait (%p958_p6), %s191_s25, 64  }
  0x57   : > { %663 = vsyncadd (%p958_p6), %s191_s25, 4294967232  ;;  %p959_p4 = scmp.ne.s32.totalorder %s951_s21, 0 }
  0x59   : > { %665 = dma.done.wait (%p959_p4), [#allocation4], 64  }
  0x5a   : > { %667 = vsyncadd (%p959_p4), [#allocation4], 4294967232 }
  0x5b   : > { %669 = dma.done.wait (%p959_p4), [#allocation5], 16  }
  0x5c   : > { %671 = vsyncadd (%p959_p4), [#allocation5], 4294967280 }
  0x5d   : > { %207 = sfence }
  0x5e   : > { %s238_s23 = sld [smem:[#allocation6]]  ;;  %s463_s10 = sld [smem:[#allocation6 + $0x1]]  ;;  %v237_v0 = vld [vmem:[%s194_s30] sm:$0xf]  ;;  %vm325_vm0 = vcmask 1040384   ;;  %vm327_vm1 = vcmask 1041408  }
  0x5f   : > { %s464_s12 = sld [smem:[#allocation6 + $0x2]]  ;;  %s465_s27 = sld [smem:[#allocation6 + $0x3]] }
  0x60   : > { %s466_s22 = sld [smem:[#allocation6 + $0x80]]  ;;  %s467_s29 = sld [smem:[#allocation6 + $0x81]] }
  0x61   : > { %s468_s28 = sld [smem:[#allocation6 + $0x82]]  ;;  %s469_s5 = sld [smem:[#allocation6 + $0x83]] }
  0x62   : > { %s471_s21 = sld [smem:[#allocation6 + $0x100]]  ;;  %s472_s6 = sld [smem:[#allocation6 + $0x101]] }
  0x63   : > { %s893_s26 = sld [smem:[#allocation6 + $0x102]]  ;;  %s895_s7 = sld [smem:[#allocation6 + $0x103]] }
  0x64   : > { %v239_v1 = vstv %s238_s23  ;;  %v242_v2 = vstv %s463_s10  ;;  %p229_p5 = scmp.lt.s32.totalorder %s690_s16, 1  ;;  %s898_s8 = sld [smem:[#allocation7]] }
  0x65   : > { %v243_v3 = vmul.f32 %v242_v2, %v237_v0  ;;  %v240_v4 = vmul.f32 %v239_v1, %v237_v0  ;;  %v249_v6 = vstv %s464_s12  ;;  %v256_v8 = vstv %s465_s27  ;;  %s900_s9 = sld [smem:[#allocation7 + $0x1]]  ;;  %p231_p2 = scmp.lt.s32.totalorder %s686_s15, 1 }
  0x66   : > { %v250_v7 = vmul.f32 %v249_v6, %v237_v0  ;;  %v257_v11 = vmul.f32 %v256_v8, %v237_v0  ;;  %v266_v12 = vstv %s466_s22  ;;  %v269_v13 = vstv %s467_s29  ;;  %s974_s16 = smov (!%p229_p5, %s690_s16), 1  ;;  %s475_s11 = sld [smem:[#allocation7 + $0x2]] }
  0x67   : > { %v245_v5 = vrot.slane %v243_v3, 1  ;;  %v276_v14 = vstv %s468_s28  ;;  %v267_v15 = vmul.f32 %v266_v12, %v237_v0  ;;  %v270_v16 = vmul.f32 %v269_v13, %v237_v0  ;;  %s976_s15 = smov (!%p231_p2, %s686_s15), 1  ;;  %s461_s4 = sshll.u32 %s974_s16, 1 }
  0x68   : > { %v252_v10 = vrot.slane %v250_v7, 2  ;;  %v277_v17 = vmul.f32 %v276_v14, %v237_v0  ;;  %v283_v18 = vstv %s469_s5  ;;  %v293_v20 = vstv %s471_s21  ;;  %s234_s25 = sadd.s32 %s461_s4, %s976_s15 }
  0x69   : > { %v247_v9 = vadd.f32 %v245_v5, %v240_v4  ;;  %v284_v19 = vmul.f32 %v283_v18, %v237_v0  ;;  %v296_v21 = vstv %s472_s6  ;;  %v259_v23 = vrot.slane %v257_v11, 3  ;;  %s462_s30 = sshll.u32 %s234_s25, 2 }
  0x6a   : > { %v272_v24 = vrot.slane %v270_v16, 1  ;;  %v279_v25 = vrot.slane %v277_v17, 2  ;;  %v294_v26 = vmul.f32 %v293_v20, %v237_v0  ;;  %v297_v27 = vmul.f32 %v296_v21, %v237_v0  ;;  %s236_s10 = scalar_lea.vmem %s946_s3, %s462_s30 }
  0x6b   : > { %v254_v22 = vadd.f32 %v252_v10, %v247_v9  ;;  %v303_v28 = vstv %s893_s26  ;;  %v310_v29 = vstv %s895_s7  ;;  %v286_v31 = vrot.slane %v284_v19, 3 }
  0x6c   : > { %v274_v30 = vadd.f32 %v272_v24, %v267_v15  ;;  %v304_v32 = vmul.f32 %v303_v28, %v237_v0  ;;  %v311_v33 = vmul.f32 %v310_v29, %v237_v0  ;;  %v299_v34 = vrot.slane %v297_v27, 1 }
  0x6d   : > { %v261_v35 = vadd.f32 %v259_v23, %v254_v22  ;;  %v263_v38 = vstv %s898_s8  ;;  %v290_v39 = vstv %s900_s9  ;;  %v317_v46 = vstv %s475_s11 }
  0x6e   : > { %v281_v36 = vadd.f32 %v279_v25, %v274_v30  ;;  %v306_v37 = vrot.slane %v304_v32, 2  ;;  %v301_v40 = vadd.f32 %v299_v34, %v294_v26  ;;  %v313_v41 = vrot.slane %v311_v33, 3 }
  0x6f   : > { %v264_v44 = vadd.f32 %v263_v38, %v261_v35 }
  0x70   : > { %v288_v42 = vadd.f32 %v286_v31, %v281_v36  ;;  %v308_v43 = vadd.f32 %v306_v37, %v301_v40 }
  0x72   : > { %v291_v45 = vadd.f32 %v290_v39, %v288_v42  ;;  %v315_v47 = vadd.f32 %v313_v41, %v308_v43 }
  0x74   : > { %v320_v48 = vrot.slane %v291_v45, 7  ;;  %v318_v49 = vadd.f32 %v317_v46, %v315_v47 }
  0x76   : > { %v326_v50 = vsel %vm325_vm0, %v264_v44, %v320_v48  ;;  %v323_v51 = vrot.slane %v318_v49, 6 }
  0x78   : > { %v328_v52 = vsel %vm327_vm1, %v326_v50, %v323_v51 }
  0x79   : > { %329 = vst [vmem:[%s236_s10] sm:$0x7] %v328_v52 }
  0x7a PF: > { %s18_s19 = sadd.s32 1, %s702_s19   ;;  %s960_s12 = smov %s678_s13 }
  0x7b   : > { %p15_p10 = scmp.ge.s32.totalorder %s18_s19, 6   ;;  %s961_s13 = smov %s682_s14 }
  0x7c   : > { %s962_s14 = smov %s841_s1  ;;  %s963_s15 = smov %s694_s17 }
  0x7d   : > { %s964_s16 = smov %s698_s18  ;;  %s965_s17 = smov %s968_s20 }
  0x7e   : > { %s966_s18 = smov %s972_s24  ;;  %17 = sbr.rel (!%p15_p10) target bundleno = 9 (0x9), region = 82 }
  0x85   :  { %357 = vsyncpa [#allocation3], 1 }
  0x86   :  { %359 = vsyncpa [#allocation3 + $0x1], 1 }
  0x87   :  { %360 = vsyncpa [#allocation4], 1 }
  0x88   :  { %362 = vsyncpa [#allocation4 + $0x1], 1 }
  0x89   :  { %363 = vsyncpa [#allocation5], 1 }
  0x8a   :  { %365 = vsyncpa [#allocation5 + $0x1], 1 }

</bundles_post_ra>
